<compile_context>
chip_gen: v6e
topology: v6e:2x2x1
jax: 0.10.0
libtpu: 0.0.40
codegen_flags: <defaults>
</compile_context>

<pallas_src>
import math
import functools

import numpy as np
import jax
import jax.numpy as jnp
from jax.experimental import pallas as pl
from jax.experimental.pallas import tpu as pltpu

_INV_SQRT2 = 0.7071067811865475
_SQRT2 = 1.4142135623730951


def _gelu_exact(x):
    # PyTorch nn.GELU() default (approximate='none') -> erf-based GELU.
    return 0.5 * x * (1.0 + jax.lax.erf(x * jnp.float32(_INV_SQRT2)))


def upunit_kernel(x_ref, w_ref, b_ref, m_ref, o_ref, p_ref, *,
                  H, W, C_in, halo_lo, shifts, mask_row, mxu_dtype):
    """One batch element per grid step.

    x_ref: (1, C_in, Hp*W)            flattened, H-halo-padded input
    w_ref: (s*s*C_out, n_shifts*C_in) block-structured ConvT weights
    b_ref: (s*s*C_out, 1)             bias, tiled per phase
    m_ref: (n_masks, H*W)             0/1 column-validity masks (per dw)
    o_ref: (1, s*s*C_out, H*W)        phase-blocked, lane-dense output
    p_ref: (n_shifts*C_in, H*W)       VMEM scratch: stacked shifted patches
    """
    HW = H * W
    # Hoisted unique-shift patches -> one stacked VMEM tile.  Each shift is a
    # single contiguous static slice of the flat input; dw-clipped columns are
    # zeroed with a precomputed 0/1 mask row (row wrap lands in a zero halo row
    # and/or is masked too).
    for si, (dh, dw) in enumerate(shifts):                   # static unroll
        start = (dh + halo_lo) * W + dw                      # python int
        patch = x_ref[0, :, start:start + HW]                # (C_in, H*W)
        mrow = mask_row.get(dw, -1)
        if mrow >= 0:
            patch = patch * m_ref[mrow:mrow + 1, :]
        p_ref[si * C_in:(si + 1) * C_in, :] = patch
    # One combined GEMM for all s*s phases; f32 accumulation on the MXU.
    y = jnp.dot(w_ref[...].astype(mxu_dtype), p_ref[...].astype(mxu_dtype),
                preferred_element_type=jnp.float32)
    y = _gelu_exact(y + b_ref[...].astype(jnp.float32))
    o_ref[0] = y.astype(o_ref.dtype)                         # single 256-lane store


def up_unit_forward(x_nchw, weight, bias, *, kernel_size, upscale_factor=2,
                    mxu_dtype=jnp.float32):
    """UpUnit forward: ConvTranspose2d(stride=up, padding=auto,
    output_size=(H*up, W*up)) followed by exact GELU.

    x_nchw: (B, C_in, H, W) f32;  weight: (C_in, C_out, K, K);  bias: (C_out,)
    returns (B, C_out, H*up, W*up)
    """
    B, C_in, H, W = x_nchw.shape
    C_out = weight.shape[1]
    K, s = kernel_size, upscale_factor
    HW = H * W

    # padding exactly as in UpUnit.__init__; output_padding implied by output_size=
    desired = H * s
    no_pad = (H - 1) * s + (K - 1) + 1
    p = (no_pad - desired + 1) // 2
    H_out, W_out = H * s, W * s
    op = s + 2 * p - K
    assert 0 <= op < s, "requested output size not reachable"

    # Per-residue taps: output o = q*s + r gathers input q + d through tap k,
    # where (r + p - k) % s == 0 and d = (r + p - k) // s; taps partition exactly.
    def taps_for(r):
        return [(k, (r + p - k) // s) for k in range(K) if (r + p - k) % s == 0]
    taps_1d = [taps_for(r) for r in range(s)]        # identical for H and W

    d_unique = sorted({d for t in taps_1d for (_, d) in t})
    d_min, d_max = (d_unique[0], d_unique[-1]) if d_unique else (0, 0)
    # Row halo covers row shifts; +1 extra row absorbs the column-shift wrap of
    # the flattened contiguous slices (wrapped elements are masked to zero).
    halo_lo = max(0, -d_min) + (1 if d_min < 0 else 0)
    halo_hi = max(0, d_max) + (1 if d_max > 0 else 0)
    Hp = H + halo_lo + halo_hi

    # Unique (dh, dw) shifts (every pair of the cross product is used by some phase).
    shifts = [(dh, dw) for dh in d_unique for dw in d_unique]
    shift_index = {sh: i for i, sh in enumerate(shifts)}
    n_shifts = len(shifts)

    # Static bounds check: every shifted slice must stay inside the padded input
    # (VMEM refs have no runtime bounds checks; never rely on the mask to hide OOB).
    for (dh, dw) in shifts:
        start = (dh + halo_lo) * W + dw
        assert 0 <= start and start + HW <= Hp * W, (
            f"shift {(dh, dw)}: slice [{start}, {start + HW}) escapes padded "
            f"input of size {Hp * W}")

    x_pad = jnp.pad(x_nchw, ((0, 0), (0, 0), (halo_lo, halo_hi), (0, 0)))
    x_flat = x_pad.reshape(B, C_in, Hp * W)          # free row-major reshape

    # 2-D phase tap lists (kh, dh, kw, dw); phase index ph = rh*s + rw.
    taps = []
    for rh in range(s):
        for rw in range(s):
            taps.append([(kh, dh, kw, dw)
                         for (kh, dh) in taps_1d[rh]
                         for (kw, dw) in taps_1d[rw]])

    # Column-validity masks (one row per column shift dw that can clip).
    mask_rows, mask_row = [], {}
    qw = np.arange(W)
    for dw in d_unique:
        valid = (qw + dw >= 0) & (qw + dw < W)
        if not valid.all():
            mask_row[dw] = len(mask_rows)
            mask_rows.append(np.tile(valid.astype(np.float32), H))
    wmask = (jnp.asarray(np.stack(mask_rows)) if mask_rows
             else jnp.ones((1, HW), jnp.float32))

    # Block-structured combined weight: (s*s*C_out, n_shifts*C_in).
    # Block (ph, si) holds weight[:, :, kh, kw]^T for the (unique) tap of phase
    # ph that uses shift si; zeros where a phase does not touch a shift.
    w_blk = jnp.zeros((s * s * C_out, n_shifts * C_in), weight.dtype)
    for ph, tap_list in enumerate(taps):
        for (kh, dh, kw, dw) in tap_list:
            si = shift_index[(dh, dw)]
            w_blk = w_blk.at[ph * C_out:(ph + 1) * C_out,
                             si * C_in:(si + 1) * C_in].add(weight[:, :, kh, kw].T)
    b_blk = jnp.tile(bias, s * s).reshape(s * s * C_out, 1)

    kern = functools.partial(upunit_kernel, H=H, W=W, C_in=C_in,
                             halo_lo=halo_lo, shifts=shifts,
                             mask_row=mask_row, mxu_dtype=mxu_dtype)
    out_ph = pl.pallas_call(
        kern,
        out_shape=jax.ShapeDtypeStruct((B, s * s * C_out, HW), x_nchw.dtype),
        grid_spec=pltpu.PrefetchScalarGridSpec(
            num_scalar_prefetch=0,
            grid=(B,),
            in_specs=[
                pl.BlockSpec((1, C_in, Hp * W), lambda b: (b, 0, 0)),
                # w/b/mask are grid-invariant (constant index maps): their DMA
                # is skipped after step 0.  Mark them pl.Buffered(1) once the
                # channel counts make the default double-buffering costly.
                pl.BlockSpec((s * s * C_out, n_shifts * C_in), lambda b: (0, 0)),
                pl.BlockSpec((s * s * C_out, 1), lambda b: (0, 0)),
                pl.BlockSpec(wmask.shape, lambda b: (0, 0)),
            ],
            out_specs=pl.BlockSpec((1, s * s * C_out, HW), lambda b: (b, 0, 0)),
            scratch_shapes=[pltpu.VMEM((n_shifts * C_in, HW), jnp.float32)],
        ),
        compiler_params=pltpu.CompilerParams(
            dimension_semantics=("parallel",)),
    )(x_flat, w_blk, b_blk, wmask)

    # Phase-blocked -> NCHW.  The stride-2 phase interleave is a lane shuffle;
    # Mosaic has no safe general lane-permute (lane-merging reshapes /
    # lane-strided stores), so this small relayout stays one fused XLA
    # transpose+reshape inside the jitted wrapper.
    # TODO(synk): move the rw column interleave in-kernel if Mosaic gains a
    # reliable lane-interleave (stack + trailing reshape across lanes).
    out = out_ph.reshape(B, s, s, C_out, H, W)
    out = jnp.transpose(out, (0, 3, 4, 1, 5, 2)).reshape(B, C_out, H_out, W_out)
    return out


def ref_forward(x_nchw, weight, bias, *, kernel_size, upscale_factor=2):
    """Independent reference via lhs-dilated XLA convolution."""
    B, C_in, H, W = x_nchw.shape
    K, s = kernel_size, upscale_factor
    desired = H * s
    no_pad = (H - 1) * s + (K - 1) + 1
    p = (no_pad - desired + 1) // 2
    op = H * s - ((H - 1) * s - 2 * p + (K - 1) + 1)
    w_flip = jnp.transpose(weight[:, :, ::-1, ::-1], (1, 0, 2, 3))  # OIHW
    y = jax.lax.conv_general_dilated(
        x_nchw, w_flip, window_strides=(1, 1),
        padding=[(K - 1 - p, K - 1 - p + op)] * 2,
        lhs_dilation=(s, s),
        dimension_numbers=('NCHW', 'OIHW', 'NCHW'))
    y = y + bias[None, :, None, None]
    return 0.5 * y * (1.0 + jax.lax.erf(y / jnp.float32(_SQRT2)))


if __name__ == "__main__":
    B, C_in, H, W = 2, 4, 16, 16
    C_out, K, s = 8, 3, 2

    key = jax.random.PRNGKey(0)
    kx, kw, kb = jax.random.split(key, 3)
    x = jax.random.normal(kx, (B, C_in, H, W), jnp.float32)
    fan = C_in * K * K
    weight = jax.random.normal(kw, (C_in, C_out, K, K), jnp.float32) / math.sqrt(fan)
    bias = 0.1 * jax.random.normal(kb, (C_out,), jnp.float32)

    fwd = jax.jit(functools.partial(up_unit_forward, kernel_size=K, upscale_factor=s))
    out = jax.block_until_ready(fwd(x, weight, bias))
    assert out.shape == (B, C_out, H * s, W * s), out.shape

    ref = ref_forward(x, weight, bias, kernel_size=K, upscale_factor=s)
    err = float(jnp.max(jnp.abs(out - ref)))
    assert err < 1e-4, f"max abs error {err}"

    print("KERNEL_OK")
</pallas_src>

<mosaic_0001>
module attributes {stable_mosaic.version = 11 : i64} {
  func.func @upunit_kernel(%arg0: i32, %arg1: memref<1x4x288xf32, #tpu.memory_space<vmem>>, %arg2: memref<32x16xf32, #tpu.memory_space<vmem>>, %arg3: memref<32x1xf32, #tpu.memory_space<vmem>>, %arg4: memref<1x256xf32, #tpu.memory_space<vmem>>, %arg5: memref<1x32x256xf32, #tpu.memory_space<vmem>>, %arg6: memref<16x256xf32, #tpu.memory_space<vmem>>) attributes {dimension_semantics = [#tpu.dimension_semantics<parallel>], iteration_bounds = array<i64: 2>, scalar_prefetch = 0 : i64, scratch_operands = 1 : i64, tpu.core_type = #tpu.core_type<tc>, window_params = [{transform_indices = @transform_0, window_bounds = array<i64: 1, 4, 288>}, {pipeline_mode = #tpu.pipeline_mode<synchronous>, transform_indices = @transform_1, window_bounds = array<i64: 32, 16>}, {pipeline_mode = #tpu.pipeline_mode<synchronous>, transform_indices = @transform_2, window_bounds = array<i64: 32, 1>}, {pipeline_mode = #tpu.pipeline_mode<synchronous>, transform_indices = @transform_3, window_bounds = array<i64: 1, 256>}, {transform_indices = @transform_4, window_bounds = array<i64: 1, 32, 256>}]} {
    %c0 = arith.constant 0 : index
    %c0_0 = arith.constant 0 : index
    %c0_1 = arith.constant 0 : index
    %0 = vector.load %arg1[%c0, %c0_0, %c0_1] : memref<1x4x288xf32, #tpu.memory_space<vmem>>, vector<1x4x256xf32>
    %1 = vector.shape_cast %0 : vector<1x4x256xf32> to vector<4x256xf32>
    %c0_2 = arith.constant 0 : index
    %c0_3 = arith.constant 0 : index
    %2 = vector.load %arg6[%c0_2, %c0_3] : memref<16x256xf32, #tpu.memory_space<vmem>>, vector<4x256xf32>
    tpu.vector_store %arg6[%c0_2, %c0_3], %1 {strides = array<i32>} : memref<16x256xf32, #tpu.memory_space<vmem>>, vector<4x256xf32>,
    %c0_4 = arith.constant 0 : index
    %c0_5 = arith.constant 0 : index
    %c1 = arith.constant 1 : index
    %3 = vector.load %arg1[%c0_4, %c0_5, %c1] : memref<1x4x288xf32, #tpu.memory_space<vmem>>, vector<1x4x256xf32>
    %4 = vector.shape_cast %3 : vector<1x4x256xf32> to vector<4x256xf32>
    %c0_6 = arith.constant 0 : index
    %c0_7 = arith.constant 0 : index
    %5 = vector.load %arg4[%c0_6, %c0_7] : memref<1x256xf32, #tpu.memory_space<vmem>>, vector<1x256xf32>
    %6 = vector.broadcast %5 : vector<1x256xf32> to vector<4x256xf32>
    %7 = arith.mulf %4, %6 : vector<4x256xf32>
    %c4 = arith.constant 4 : index
    %c0_8 = arith.constant 0 : index
    %8 = vector.load %arg6[%c4, %c0_8] : memref<16x256xf32, #tpu.memory_space<vmem>>, vector<4x256xf32>
    tpu.vector_store %arg6[%c4, %c0_8], %7 {strides = array<i32>} : memref<16x256xf32, #tpu.memory_space<vmem>>, vector<4x256xf32>,
    %c0_9 = arith.constant 0 : index
    %c0_10 = arith.constant 0 : index
    %c16 = arith.constant 16 : index
    %9 = vector.load %arg1[%c0_9, %c0_10, %c16] : memref<1x4x288xf32, #tpu.memory_space<vmem>>, vector<1x4x256xf32>
    %10 = vector.shape_cast %9 : vector<1x4x256xf32> to vector<4x256xf32>
    %c8 = arith.constant 8 : index
    %c0_11 = arith.constant 0 : index
    %11 = vector.load %arg6[%c8, %c0_11] : memref<16x256xf32, #tpu.memory_space<vmem>>, vector<4x256xf32>
    tpu.vector_store %arg6[%c8, %c0_11], %10 {strides = array<i32>} : memref<16x256xf32, #tpu.memory_space<vmem>>, vector<4x256xf32>,
    %c0_12 = arith.constant 0 : index
    %c0_13 = arith.constant 0 : index
    %c17 = arith.constant 17 : index
    %12 = vector.load %arg1[%c0_12, %c0_13, %c17] : memref<1x4x288xf32, #tpu.memory_space<vmem>>, vector<1x4x256xf32>
    %13 = vector.shape_cast %12 : vector<1x4x256xf32> to vector<4x256xf32>
    %c0_14 = arith.constant 0 : index
    %c0_15 = arith.constant 0 : index
    %14 = vector.load %arg4[%c0_14, %c0_15] : memref<1x256xf32, #tpu.memory_space<vmem>>, vector<1x256xf32>
    %15 = vector.broadcast %14 : vector<1x256xf32> to vector<4x256xf32>
    %16 = arith.mulf %13, %15 : vector<4x256xf32>
    %c12 = arith.constant 12 : index
    %c0_16 = arith.constant 0 : index
    %17 = vector.load %arg6[%c12, %c0_16] : memref<16x256xf32, #tpu.memory_space<vmem>>, vector<4x256xf32>
    tpu.vector_store %arg6[%c12, %c0_16], %16 {strides = array<i32>} : memref<16x256xf32, #tpu.memory_space<vmem>>, vector<4x256xf32>,
    %c0_17 = arith.constant 0 : index
    %c0_18 = arith.constant 0 : index
    %18 = vector.load %arg2[%c0_17, %c0_18] : memref<32x16xf32, #tpu.memory_space<vmem>>, vector<32x16xf32>
    %c0_19 = arith.constant 0 : index
    %c0_20 = arith.constant 0 : index
    %19 = vector.load %arg6[%c0_19, %c0_20] : memref<16x256xf32, #tpu.memory_space<vmem>>, vector<16x256xf32>
    %cst = arith.constant dense<0.000000e+00> : vector<32x256xf32>
    %20 = tpu.matmul %18, %19, %cst {dimension_numbers = #tpu.dot_dimension_numbers<[1], [0], [0], [1], [0, 0, 1, 1], [], []>} : vector<32x16xf32>, vector<16x256xf32>, vector<32x256xf32> -> vector<32x256xf32>
    %c0_21 = arith.constant 0 : index
    %c0_22 = arith.constant 0 : index
    %21 = vector.load %arg3[%c0_21, %c0_22] : memref<32x1xf32, #tpu.memory_space<vmem>>, vector<32x1xf32>
    %22 = vector.broadcast %21 : vector<32x1xf32> to vector<32x256xf32>
    %23 = arith.addf %20, %22 : vector<32x256xf32>
    %cst_23 = arith.constant 5.000000e-01 : f32
    %24 = vector.broadcast %cst_23 : f32 to vector<32x256xf32>
    %25 = arith.mulf %24, %23 : vector<32x256xf32>
    %cst_24 = arith.constant 0.707106769 : f32
    %26 = vector.broadcast %cst_24 : f32 to vector<32x256xf32>
    %27 = arith.mulf %23, %26 : vector<32x256xf32>
    %28 = math.erf %27 : vector<32x256xf32>
    %cst_25 = arith.constant 1.000000e+00 : f32
    %29 = vector.broadcast %cst_25 : f32 to vector<32x256xf32>
    %30 = arith.addf %29, %28 : vector<32x256xf32>
    %31 = arith.mulf %25, %30 : vector<32x256xf32>
    %c0_26 = arith.constant 0 : index
    %c0_27 = arith.constant 0 : index
    %c0_28 = arith.constant 0 : index
    %32 = vector.load %arg5[%c0_26, %c0_27, %c0_28] : memref<1x32x256xf32, #tpu.memory_space<vmem>>, vector<1x32x256xf32>
    %33 = vector.shape_cast %32 : vector<1x32x256xf32> to vector<32x256xf32>
    %34 = vector.shape_cast %31 : vector<32x256xf32> to vector<1x32x256xf32>
    tpu.vector_store %arg5[%c0_26, %c0_27, %c0_28], %34 {strides = array<i32>} : memref<1x32x256xf32, #tpu.memory_space<vmem>>, vector<1x32x256xf32>,
    return
  }
  func.func @transform_0(%arg0: i32) -> (i32, i32, i32) {
    %c0_i32 = arith.constant 0 : i32
    %c0_i32_0 = arith.constant 0 : i32
    %c0_i32_1 = arith.constant 0 : i32
    return %arg0, %c0_i32, %c0_i32_0 : i32, i32, i32
  }
  func.func @transform_1(%arg0: i32) -> (i32, i32) {
    %c0_i32 = arith.constant 0 : i32
    %c0_i32_0 = arith.constant 0 : i32
    %c0_i32_1 = arith.constant 0 : i32
    return %c0_i32, %c0_i32_0 : i32, i32
  }
  func.func @transform_2(%arg0: i32) -> (i32, i32) {
    %c0_i32 = arith.constant 0 : i32
    %c0_i32_0 = arith.constant 0 : i32
    %c0_i32_1 = arith.constant 0 : i32
    return %c0_i32, %c0_i32_0 : i32, i32
  }
  func.func @transform_3(%arg0: i32) -> (i32, i32) {
    %c0_i32 = arith.constant 0 : i32
    %c0_i32_0 = arith.constant 0 : i32
    %c0_i32_1 = arith.constant 0 : i32
    return %c0_i32, %c0_i32_0 : i32, i32
  }
  func.func @transform_4(%arg0: i32) -> (i32, i32, i32) {
    %c0_i32 = arith.constant 0 : i32
    %c0_i32_0 = arith.constant 0 : i32
    %c0_i32_1 = arith.constant 0 : i32
    return %arg0, %c0_i32, %c0_i32_0 : i32, i32, i32
  }
}

</mosaic_0001>

<bundles_post_ra>
// kernel: tile.8
= control target key start
LH: loop header
LB: loop body
LE: loop exit
PB: predicated region body
PF: predicated region fallthrough
CT: control target
= control target key end

     0   :  { %s22_s0 = inlined_call_operand.vmem [shape: f32[8], index: 0, kind: input, shape index: {}]   ;;  %s23_s1 = inlined_call_operand.vmem [shape: f32[4,8], index: 1, kind: output, shape index: {}]  }
   0x1   :  { %v4_v0 = vld [vmem:[%s22_s0] ss:$0 sm:$0xff] }
   0x2   :  { %5 = vst [vmem:[%s23_s1] sm:$0xf] %v4_v0 }

// kernel: tile.0
= control target key start
LH: loop header
LB: loop body
LE: loop exit
PB: predicated region body
PF: predicated region fallthrough
CT: control target
= control target key end

     0   :  { %s67_s8 = smov 125   ;;  %vm8_vm0 = vcmask 7168   ;;  %s68_s11 = smov 126   ;;  %s118_s0 = inlined_call_operand.vmem [shape: f32[4,8], index: 0, kind: input, shape index: {}]   ;;  %s119_s1 = inlined_call_operand.vmem [shape: f32[32,1], index: 1, kind: output, shape index: {}]  }
   0x1   :  { %v5_v0 = vld [vmem:[%s118_s0] sm:$0xf]  ;;  %s66_s0 = smov 127   ;;  %s69_s12 = smov 124  }
   0x2   :  { %6 = vst [vmem:[#allocation0] sm:$0xf] %v5_v0  ;;  %s70_s13 = smov 123   ;;  %s71_s14 = smov 122  }
   0x3   :  { %s72_s15 = smov 121  }
   0x9   :  { %v10_v1 = vld [vmem:[#allocation0] sm:$0xf]  }
   0xa   :  { %v22_v2 = vld [vmem:[#allocation0] sm:$0xf]   ;;  %11 = vrot.lane.b32.xlu0 %v10_v1, %s66_s0 }
   0xb   :  { %23 = vrot.lane.b32.xlu1 %v22_v2, %s67_s8  ;;  %v16_v3 = vld [vmem:[#allocation0] sm:$0xf]  }
   0xc   :  { %v28_v4 = vld [vmem:[#allocation0] sm:$0xf]  }
   0xd   :  { %v7_v5 = vld [vmem:[#allocation0] sm:$0xf]  }
   0xe   :  { %9 = vst.msk [vmem:[%s119_s1] ss:$8 sm:$0xf] %vm8_vm0, %v7_v5   ;;  %17 = vrot.lane.b32.xlu0 %v16_v3, %s68_s11  ;;  %v34_v6 = vld [vmem:[#allocation0] sm:$0xf]  }
   0xf   :  { %29 = vrot.lane.b32.xlu1 %v28_v4, %s69_s12  ;;  %v40_v7 = vld [vmem:[#allocation0] sm:$0xf]  }
  0x10   :  { %v46_v8 = vld [vmem:[#allocation0] sm:$0xf]  }
  0x12   :  { %35 = vrot.lane.b32.xlu0 %v34_v6, %s70_s13 }
  0x13   :  { %41 = vrot.lane.b32.xlu1 %v40_v7, %s71_s14 }
  0x16   :  { %47 = vrot.lane.b32.xlu0 %v46_v8, %s72_s15 }
  0x7c   :  { %v12_v9 = vpop.permute.xlu0 %11  }
  0x7d   :  { %v24_v10 = vpop.permute.xlu1 %23   ;;  %52 = vst.msk [vmem:[%s119_s1 + $0x1] ss:$8 sm:$0xf] %vm8_vm0, %v12_v9  }
  0x7e   :  { %54 = vst.msk [vmem:[%s119_s1 + $0x3] ss:$8 sm:$0xf] %vm8_vm0, %v24_v10  }
  0x80   :  { %v18_v11 = vpop.permute.xlu0 %17  }
  0x81   :  { %v30_v12 = vpop.permute.xlu1 %29   ;;  %53 = vst.msk [vmem:[%s119_s1 + $0x2] ss:$8 sm:$0xf] %vm8_vm0, %v18_v11  }
  0x82   :  { %55 = vst.msk [vmem:[%s119_s1 + $0x4] ss:$8 sm:$0xf] %vm8_vm0, %v30_v12  }
  0x84   :  { %v36_v13 = vpop.permute.xlu0 %35  }
  0x85   :  { %v42_v14 = vpop.permute.xlu1 %41   ;;  %56 = vst.msk [vmem:[%s119_s1 + $0x5] ss:$8 sm:$0xf] %vm8_vm0, %v36_v13  }
  0x86   :  { %57 = vst.msk [vmem:[%s119_s1 + $0x6] ss:$8 sm:$0xf] %vm8_vm0, %v42_v14  }
  0x88   :  { %v48_v15 = vpop.permute.xlu0 %47  }
  0x89   :  { %58 = vst.msk [vmem:[%s119_s1 + $0x7] ss:$8 sm:$0xf] %vm8_vm0, %v48_v15  }

// kernel: up_unit_forward.1
= control target key start
LH: loop header
LB: loop body
LE: loop exit
PB: predicated region body
PF: predicated region fallthrough
CT: control target
= control target key end

     0   :  { %s631_s15 = smov 0   ;;  %s700_s0 = inlined_call_operand.vmem [shape: f32[2,4,288], index: 0, kind: input, shape index: {}]   ;;  %s701_s1 = inlined_call_operand.vmem [shape: f32[32,16], index: 1, kind: input, shape index: {}]   ;;  %s702_s2 = inlined_call_operand.vmem [shape: f32[32,1], index: 2, kind: input, shape index: {}]   ;;  %s703_s3 = inlined_call_operand.vmem [shape: f32[1,256], index: 3, kind: input, shape index: {}]   ;;  %s704_s4 = inlined_call_operand.vmem [shape: f32[2,32,256], index: 4, kind: output, shape index: {}]  }
   0x1 LB: > { %s537_s16 = sadd.s32 4294967295, %s597_s15   ;;  %p541_p0 = scmp.ge.s32.totalorder %s597_s15, 1  ;;  %s597_s15 = sphi %s631_s15, %s14_s15  }
   0x2   : > { %p162_p1 = scmp.lt.s32.totalorder %s597_s15, 3 }
   0x4   : > { %p163_p2 = pnand %p541_p0, %p162_p1 }
   0x5   : > { %p188_p3 = scmp.lt.s32.totalorder (!%p163_p2), %s537_s16, 1  ;;  %s599_s25 = smov (!%p163_p2), 112  }
   0x6   : > { %166 = sbr.rel (%p163_p2) target bundleno = 499 (0x1f3), region = 36  ;;  %s600_s26 = smov (!%p163_p2), 17  }
   0x7   : > { %s601_s27 = smov (!%p163_p2), 1   ;;  %s602_s28 = smov (!%p163_p2), 111  }
   0x8   : > { %s603_s29 = smov (!%p163_p2), 127  }
   0xb   : > { %v208_v0 = vlaneseq  ;;  %v263_v2 = vld [vmem:[%s703_s3] sm:$0x3]  ;;  %s706_s16 = smov (!%p188_p3, %s537_s16), 1  ;;  %vm277_vm0 = vcmask 138240   ;;  %vm254_vm1 = vcmask 916480   ;;  %vm220_vm2 = vcmask 7168  }
   0xc   : > { %v206_v3 = vld [vmem:[%s703_s3] sm:$0x3]  ;;  %s556_s21 = smul.u32 12, %s706_s16  ;;  %v604_v35 = vmov 0.0   ;;  %v605_v38 = vmov 0   ;;  %v309_v39 = vld [vmem:[%s702_s2 + $0x8] sm:$0xff] }
   0xd   : > { %v209_v1 = vshrl.u32 %v208_v0, 7  ;;  %409 = vmatprep.mubr.f32.mxu0 %v604_v35  ;;  %421 = vmatprep.mubr.f32.mxu1 %v604_v35  ;;  %v308_v37 = vld [vmem:[%s702_s2] sm:$0xff]  ;;  %v310_v40 = vld [vmem:[%s702_s2 + $0x10] sm:$0xff]  ;;  %v311_v41 = vld [vmem:[%s702_s2 + $0x18] sm:$0xff]  ;;  %vm293_vm3 = vcmask 908288   ;;  %vm236_vm4 = vcmask 1039360  }
   0xe   : > { %s651_s24 = scalar_lea.vmem %s700_s0, %s556_s21  ;;  %572 = vset.pattern.permute.xlu1 %v605_v38  ;;  %573 = vset.pattern.permute.xlu0 %v605_v38  ;;  %v300_v55 = vld [vmem:[%s701_s1] sm:$0xff]  ;;  %vm332_vm5 = vcmask 130048   ;;  %v302_v56 = vld [vmem:[%s701_s1 + $0x10] sm:$0xff]  ;;  %v301_v58 = vld [vmem:[%s701_s1 + $0x8] sm:$0xff]  ;;  %s551_s22 = sshll.u32 %s706_s16, 6 }
   0xf   : > { %v210_v4 = vsub.s32 0, %v209_v1  ;;  %v214_v5 = vsub.s32 1, %v209_v1  ;;  %v244_v11 = vld [vmem:[%s651_s24 + $0x8] sm:$0xf]  ;;  %v198_v12 = vld [vmem:[%s651_s24] sm:$0xff]  ;;  %v303_v59 = vld [vmem:[%s701_s1 + $0x18] sm:$0xff] }
  0x10   : > { %252 = vrot.lane.b32.xlu1 %v244_v11, %s599_s25  ;;  %v200_v13 = vcombine.high %v198_v12, %v198_v12  ;;  %202 = vst [vmem:[#allocation2 + $0x10] sm:$0xf] %v198_v12  ;;  %v262_v17 = vld [vmem:[%s651_s24 + $0x8] sm:$0xf] }
  0x11   : > { %v268_v6 = vrot.slane %v263_v2, %v210_v4  ;;  %v272_v7 = vrot.slane %v263_v2, %v214_v5  ;;  %v211_v8 = vrot.slane %v206_v3, %v210_v4  ;;  %v215_v9 = vrot.slane %v206_v3, %v214_v5  ;;  %v205_v27 = vld [vmem:[%s651_s24 + $0x8] sm:$0xf] }
  0x12   : > { %203 = vst [vmem:[#allocation2] sm:$0xf] %v200_v13 }
  0x13   : > { %v273_v10 = vcombine.low %v268_v6, %v272_v7  ;;  %v216_v14 = vcombine.low %v211_v8, %v215_v9 }
  0x14   : > { %250 = vrot.lane.b32.xlu1 %v200_v13, %s599_s25 }
  0x15   : > { %274 = vrot.lane.b32.xlu0 %v273_v10, %s600_s26 }
  0x19   : > { %217 = vrot.lane.b32.xlu0 %v216_v14, %s601_s27 }
  0x1d   : > { %248 = vrot.lane.b32.xlu0 %v198_v12, %s599_s25  ;;  %s687_s25 = scalar_lea.vmem %s704_s4, %s551_s22 }
  0x82   : > { %v253_v15 = vpop.permute.xlu1 %252 }
  0x86   : > { %v251_v21 = vpop.permute.xlu1 %250 }
  0x87   : > { %v275_v16 = vpop.permute.xlu0 %274  ;;  %v256_v24 = vsel %vm254_vm1, %v251_v21, %v253_v15 }
  0x88   : > { %v276_v18 = vrot.slane %v275_v16, 4  ;;  %260 = vst [vmem:[#allocation2 + $0x8] sm:$0xf] %v256_v24 }
  0x8a   : > { %v278_v19 = vsel %vm277_vm0, %v276_v18, %v275_v16  ;;  %v282_v20 = vmul.f32 %v276_v18, %v262_v17 }
  0x8b   : > { %v281_v22 = vmul.f32 %v278_v19, %v198_v12  ;;  %v218_v23 = vpop.permute.xlu0 %217 }
  0x8c   : > { %v219_v25 = vrot.slane %v218_v23, 4  ;;  %v286_v26 = vcombine.low %v282_v20, %v282_v20 }
  0x8d   : > { %289 = vrot.lane.b32.xlu0 %v281_v22, %s602_s28  ;;  %v285_v32 = vcombine.low %v281_v22, %v281_v22 }
  0x8e   : > { %v221_v28 = vsel %vm220_vm2, %v219_v25, %v218_v23  ;;  %291 = vrot.lane.b32.xlu1 %v286_v26, %s602_s28  ;;  %v225_v31 = vmul.f32 %v219_v25, %v205_v27 }
  0x8f   : > { %v224_v29 = vmul.f32 %v221_v28, %v198_v12  ;;  %v249_v30 = vpop.permute.xlu0 %248 }
  0x90   : > { %v255_v33 = vsel %vm254_vm1, %v249_v30, %v251_v21  ;;  %v229_v36 = vcombine.low %v225_v31, %v225_v31 }
  0x91   : > { %232 = vrot.lane.b32.xlu0 %v224_v29, %s603_s29  ;;  %259 = vst [vmem:[#allocation2 + $0x18] sm:$0xf] %v255_v33  ;;  %v228_v34 = vcombine.low %v224_v29, %v224_v29 }
  0x92   : > { %287 = vrot.lane.b32.xlu1 %v285_v32, %s602_s28 }
  0x95   : > { %230 = vrot.lane.b32.xlu0 %v228_v34, %s603_s29 }
  0x96   : > { %234 = vrot.lane.b32.xlu1 %v229_v36, %s603_s29 }
  0x99   : > { %319 = vperm.xlu0 %573, %v309_v39  }
  0x9a   : > { %314 = vperm.xlu1 %572, %v308_v37  }
  0x9e   : > { %324 = vperm.xlu1 %572, %v310_v40  }
  0xa2   : > { %329 = vperm.xlu1 %572, %v311_v41  }
  0xff   : > { %v290_v42 = vpop.permute.xlu0 %289 }
 0x100   : > { %v292_v43 = vpop.permute.xlu1 %291 }
 0x101   : > { %v295_v44 = vsel %vm293_vm3, %v290_v42, %v292_v43 }
 0x102   : > { %299 = vst [vmem:[#allocation2 + $0x8] sm:$0xf0] %v295_v44 }
 0x103   : > { %v233_v45 = vpop.permute.xlu0 %232 }
 0x104   : > { %v288_v46 = vpop.permute.xlu1 %287 }
 0x105   : > { %v294_v47 = vsel %vm293_vm3, %v288_v46, %v290_v42 }
 0x106   : > { %298 = vst [vmem:[#allocation2 + $0x18] sm:$0xf0] %v294_v47 }
 0x107   : > { %v231_v48 = vpop.permute.xlu0 %230 }
 0x108   : > { %v237_v49 = vsel %vm236_vm4, %v231_v48, %v233_v45  ;;  %v235_v50 = vpop.permute.xlu1 %234 }
 0x109   : > { %241 = vst [vmem:[#allocation2 + $0x10] sm:$0xf0] %v237_v49  ;;  %v238_v51 = vsel %vm236_vm4, %v233_v45, %v235_v50  ;;  %v307_v52 = vld [vmem:[#allocation2 + $0x8] sm:$0xff] }
 0x10a   : > { %242 = vst [vmem:[#allocation2] sm:$0xf0] %v238_v51  ;;  %373 = vmatprep.subr.mxu0 %v307_v52  ;;  %552 = vmatprep.subr.mxu1 %v307_v52 }
 0x10d   : > { %v306_v53 = vld [vmem:[#allocation2 + $0x18] sm:$0xff] }
 0x10e   : > { %374 = vmatpush1.msra.mxu0 %v306_v53  ;;  %554 = vmatpush1.msra.mxu1 %v306_v53 }
 0x110   : > { %v304_v57 = vld [vmem:[#allocation2 + $0x10] sm:$0xff] }
 0x111   : > { %v305_v54 = vld [vmem:[#allocation2] sm:$0xff] }
 0x112   : > { %375 = vmatprep.subr.mxu0 %v305_v54  ;;  %553 = vmatprep.subr.mxu1 %v305_v54 }
 0x113   : > { %376 = vmatpush1.msra.mxu0 %v304_v57  ;;  %555 = vmatpush1.msra.mxu1 %v304_v57 }
 0x114   : > { %545 = vmatmul.mubr.msk.f32.vlgmr.msra.gmra.mxu0 %vm332_vm5, %v300_v55  ;;  %547 = vmatmul.mubr.msk.f32.vlgmr.msra.gmra.mxu1 %vm332_vm5, %v302_v56  ;;  %v320_v2 = vpop.permute.xlu0 %319 }
 0x115   : > { %415 = vmatprep.mubr.f32.mxu0 %v604_v35  ;;  %427 = vmatprep.mubr.f32.mxu1 %v604_v35  ;;  %v315_v60 = vpop.permute.xlu1 %314 }
 0x118   : > { %546 = vmatmul.mubr.msk.f32.gmra.mxu0 %vm332_vm5, %v301_v58  ;;  %548 = vmatmul.mubr.msk.f32.gmra.mxu1 %vm332_vm5, %v303_v59 }
 0x119   : > { %v325_v61 = vpop.permute.xlu1 %324 }
 0x11d   : > { %v330_v5 = vpop.permute.xlu1 %329 }
 0x1d4   : > { %v411_v62 = vpop.f32.mrf.mxu0  ;;  %v423_v63 = vpop.f32.mrf.mxu1 }
 0x1d5   : > { %v412_v0 = vadd.f32 %v411_v62, %v315_v60  ;;  %v424_v1 = vadd.f32 %v423_v63, %v325_v61 }
 0x1d6   : > { %v413_v3 = vpop.f32.mrf.mxu0  ;;  %v425_v4 = vpop.f32.mrf.mxu1 }
 0x1d7   : > { %v442_v6 = vmul.f32 0.70710677, %v412_v0  ;;  %v446_v7 = vmul.f32 0.70710677, %v424_v1  ;;  %v414_v8 = vadd.f32 %v413_v3, %v315_v60  ;;  %v426_v9 = vadd.f32 %v425_v4, %v325_v61 }
 0x1d8   : > { %v417_v10 = vpop.f32.mrf.mxu0  ;;  %v429_v11 = vpop.f32.mrf.mxu1  ;;  %v434_v26 = vmul.f32 0.5, %v412_v0  ;;  %v438_v28 = vmul.f32 0.5, %v424_v1 }
 0x1d9   : > { %575 = verf.f32 %v442_v6  ;;  %v418_v12 = vadd.f32 %v417_v10, %v320_v2  ;;  %v430_v13 = vadd.f32 %v429_v11, %v330_v5  ;;  %v443_v14 = vmul.f32 0.70710677, %v414_v8 }
 0x1da   : > { %577 = verf.f32 %v446_v7  ;;  %v419_v15 = vpop.f32.mrf.mxu0  ;;  %v431_v16 = vpop.f32.mrf.mxu1  ;;  %v447_v17 = vmul.f32 0.70710677, %v426_v9  ;;  %v435_v34 = vmul.f32 0.5, %v414_v8  ;;  %v439_v37 = vmul.f32 0.5, %v426_v9 }
 0x1db   : > { %v444_v18 = vmul.f32 0.70710677, %v418_v12  ;;  %579 = verf.f32 %v443_v14  ;;  %v448_v19 = vmul.f32 0.70710677, %v430_v13  ;;  %v420_v20 = vadd.f32 %v419_v15, %v320_v2 }
 0x1dc   : > { %v432_v21 = vadd.f32 %v431_v16, %v330_v5  ;;  %581 = verf.f32 %v447_v17  ;;  %v436_v41 = vmul.f32 0.5, %v418_v12  ;;  %v440_v45 = vmul.f32 0.5, %v430_v13 }
 0x1dd   : > { %583 = verf.f32 %v444_v18  ;;  %v445_v22 = vmul.f32 0.70710677, %v420_v20  ;;  %v437_v49 = vmul.f32 0.5, %v420_v20 }
 0x1de   : > { %585 = verf.f32 %v448_v19  ;;  %v449_v23 = vmul.f32 0.70710677, %v432_v21  ;;  %v441_v52 = vmul.f32 0.5, %v432_v21 }
 0x1df   : > { %587 = verf.f32 %v445_v22 }
 0x1e0   : > { %589 = verf.f32 %v449_v23 }
 0x1e6   : > { %v576_v24 = vpop.eup %575 }
 0x1e7   : > { %v578_v25 = vpop.eup %577  ;;  %v458_v27 = vadd.f32 1.0, %v576_v24 }
 0x1e8   : > { %v462_v29 = vadd.f32 1.0, %v578_v25  ;;  %v580_v30 = vpop.eup %579 }
 0x1e9   : > { %v466_v31 = vmul.f32 %v458_v27, %v434_v26  ;;  %v582_v32 = vpop.eup %581  ;;  %v459_v35 = vadd.f32 1.0, %v580_v30 }
 0x1ea   : > { %v470_v33 = vmul.f32 %v462_v29, %v438_v28  ;;  %v584_v36 = vpop.eup %583  ;;  %v463_v38 = vadd.f32 1.0, %v582_v32 }
 0x1eb   : > { %474 = vst [vmem:[%s687_s25] sm:$0xff] %v466_v31  ;;  %v586_v39 = vpop.eup %585  ;;  %v467_v40 = vmul.f32 %v459_v35, %v435_v34  ;;  %v460_v42 = vadd.f32 1.0, %v584_v36 }
 0x1ec   : > { %478 = vst [vmem:[%s687_s25 + $0x20] sm:$0xff] %v470_v33  ;;  %v588_v43 = vpop.eup %587  ;;  %v471_v44 = vmul.f32 %v463_v38, %v439_v37  ;;  %v464_v46 = vadd.f32 1.0, %v586_v39 }
 0x1ed   : > { %v590_v47 = vpop.eup %589  ;;  %475 = vst [vmem:[%s687_s25 + $0x8] sm:$0xff] %v467_v40  ;;  %v468_v48 = vmul.f32 %v460_v42, %v436_v41  ;;  %v461_v50 = vadd.f32 1.0, %v588_v43 }
 0x1ee   : > { %479 = vst [vmem:[%s687_s25 + $0x28] sm:$0xff] %v471_v44  ;;  %v472_v51 = vmul.f32 %v464_v46, %v440_v45  ;;  %v465_v53 = vadd.f32 1.0, %v590_v47 }
 0x1ef   : > { %476 = vst [vmem:[%s687_s25 + $0x10] sm:$0xff] %v468_v48  ;;  %v469_v54 = vmul.f32 %v461_v50, %v437_v49 }
 0x1f0   : > { %480 = vst [vmem:[%s687_s25 + $0x30] sm:$0xff] %v472_v51  ;;  %v473_v55 = vmul.f32 %v465_v53, %v441_v52 }
 0x1f1   : > { %477 = vst [vmem:[%s687_s25 + $0x18] sm:$0xff] %v469_v54 }
 0x1f2   : > { %481 = vst [vmem:[%s687_s25 + $0x38] sm:$0xff] %v473_v55 }
 0x1f3 PF: > { %s14_s15 = sadd.s32 1, %s597_s15  }
 0x1f4   : > { %p11_p4 = scmp.ge.s32.totalorder %s14_s15, 4  }
 0x1f6   :  { %13 = sbr.rel (!%p11_p4) target bundleno = 1 (0x1), region = 66 }

</bundles_post_ra>
